<compile_context>
chip_gen: v6e
topology: v6e:2x2x1
jax: 0.10.0
libtpu: 0.0.40
codegen_flags: <defaults>
</compile_context>

<pallas_src>
import numpy as np
import jax
import jax.numpy as jnp
from jax.experimental import pallas as pl
from jax.experimental.pallas import tpu as pltpu

# ---- module config (mirrors UnimolMasker.__init__) -------------------------
MASK_TOKEN = 3
VOC_SIZE = 32
SPECIAL_TOKENS = (0, 1, 2, 3)
NUM_SPECIAL = len(SPECIAL_TOKENS)
NUM_RAND = VOC_SIZE - NUM_SPECIAL

# The closed-form sampler relies on the special tokens being a contiguous
# zero-weight prefix (true for this config).
assert tuple(SPECIAL_TOKENS) == tuple(range(NUM_SPECIAL))
# TODO(synk): a non-contiguous special-token set would need a small
#             allowed-token lookup table instead of the constant offset.

_LANE = 512            # lane-dense last dim (multiple of 128)
_MAX_BLOCK_ROWS = 256  # 256x512 int32 tile = 512 KiB; fits v5e/v6e/v7x VMEM


def _masker_kernel(tok_ref, code_ref, bits_ref, out_ref):
    tok = tok_ref[...]
    code = code_ref[...].astype(jnp.int32)   # 0 = keep, 1 = mask, 2 = random
    bits = bits_ref[...]

    # Uniform sample over the non-special suffix [NUM_SPECIAL, VOC_SIZE):
    # 24 random bits -> idx = floor(u * NUM_RAND); pure integer VPU work.
    lo = jnp.bitwise_and(bits, jnp.uint32(0xFFFFFF))
    samp = (jnp.uint32(NUM_SPECIAL)
            + ((lo * jnp.uint32(NUM_RAND)) >> jnp.uint32(24))).astype(jnp.int32)

    masked = jnp.where(code == 1, jnp.int32(MASK_TOKEN), tok)
    out_ref[...] = jnp.where(code == 2, samp, masked)


def unimol_masker(input_tokens, mask_mask, rand_mask, key):
    """input_tokens: (B, L) int; mask_mask/rand_mask: (B, L) bool or {0,1}."""
    B, L = input_tokens.shape
    n = B * L

    rows = -(-n // _LANE)
    block_rows = min(_MAX_BLOCK_ROWS, rows)
    padded_rows = -(-rows // block_rows) * block_rows
    total = padded_rows * _LANE

    tok = jnp.zeros((total,), jnp.int32).at[:n].set(
        input_tokens.reshape(-1).astype(jnp.int32))

    # Fuse the two masks into one int8 code; random overrides mask, matching
    # the assignment order of the torch forward.
    code_flat = jnp.where(rand_mask.reshape(-1) != 0, jnp.int8(2),
                          jnp.where(mask_mask.reshape(-1) != 0,
                                    jnp.int8(1), jnp.int8(0)))
    code = jnp.zeros((total,), jnp.int8).at[:n].set(code_flat)

    # Per-call, per-element random bits from the caller-supplied key.
    bits = jax.random.bits(key, (total,), dtype=jnp.uint32)

    tok2 = tok.reshape(padded_rows, _LANE)
    code2 = code.reshape(padded_rows, _LANE)
    bits2 = bits.reshape(padded_rows, _LANE)

    spec = pl.BlockSpec((block_rows, _LANE), lambda i: (i, 0))
    out2 = pl.pallas_call(
        _masker_kernel,
        out_shape=jax.ShapeDtypeStruct((padded_rows, _LANE), jnp.int32),
        grid=(padded_rows // block_rows,),
        in_specs=[spec, spec, spec],
        out_specs=spec,
        input_output_aliases={0: 0},   # token buffer is fully rewritten
        compiler_params=pltpu.CompilerParams(
            dimension_semantics=("parallel",)),
    )(tok2, code2, bits2)

    return out2.reshape(-1)[:n].reshape(B, L)


if __name__ == "__main__":
    # Deterministic example inputs.
    key = jax.random.PRNGKey(0)
    B, L = 4, 16
    k1, k2, k3 = jax.random.split(key, 3)
    input_tokens = jax.random.randint(k1, (B, L), 0, VOC_SIZE, dtype=jnp.int32)
    probs = jax.random.uniform(k2, (B, L))
    mask_mask = probs < 0.15
    rand_mask = jnp.logical_and(probs >= 0.15, probs < 0.25)

    out = unimol_masker(input_tokens, mask_mask, rand_mask, k3)
    out = jax.block_until_ready(out)

    # Semantic checks against the reference behaviour.
    out_np = np.asarray(out)
    inp_np = np.asarray(input_tokens)
    mm_np = np.asarray(mask_mask)
    rm_np = np.asarray(rand_mask)

    assert out_np.shape == (B, L) and out_np.dtype == np.int32
    # masked positions (not overridden by rand) carry the mask token
    assert np.all(out_np[mm_np & ~rm_np] == MASK_TOKEN)
    # random positions never land on special tokens and stay in-vocab
    if rm_np.any():
        assert np.all((out_np[rm_np] >= NUM_SPECIAL) & (out_np[rm_np] < VOC_SIZE))
        assert not np.isin(out_np[rm_np], np.array(SPECIAL_TOKENS)).any()
    # untouched positions are passed through unchanged
    keep = ~(mm_np | rm_np)
    assert np.all(out_np[keep] == inp_np[keep])

    print("KERNEL_OK")
</pallas_src>

<mosaic_0001>
module attributes {stable_mosaic.version = 11 : i64} {
  func.func @_masker_kernel(%arg0: i32, %arg1: memref<1x512xi32, #tpu.memory_space<vmem>>, %arg2: memref<1x512xi8, #tpu.memory_space<vmem>>, %arg3: memref<1x512xi32, #tpu.memory_space<vmem>>, %arg4: memref<1x512xi32, #tpu.memory_space<vmem>>) attributes {dimension_semantics = [#tpu.dimension_semantics<parallel>], iteration_bounds = array<i64: 1>, scalar_prefetch = 0 : i64, scratch_operands = 0 : i64, tpu.core_type = #tpu.core_type<tc>, window_params = [{transform_indices = @transform_0, window_bounds = array<i64: 1, 512>}, {transform_indices = @transform_1, window_bounds = array<i64: 1, 512>}, {transform_indices = @transform_2, window_bounds = array<i64: 1, 512>}, {transform_indices = @transform_3, window_bounds = array<i64: 1, 512>}]} {
    %c0 = arith.constant 0 : index
    %c0_0 = arith.constant 0 : index
    %0 = vector.load %arg1[%c0, %c0_0] : memref<1x512xi32, #tpu.memory_space<vmem>>, vector<1x512xi32>
    %c0_1 = arith.constant 0 : index
    %c0_2 = arith.constant 0 : index
    %1 = vector.load %arg2[%c0_1, %c0_2] : memref<1x512xi8, #tpu.memory_space<vmem>>, vector<1x512xi8>
    %2 = arith.extsi %1 : vector<1x512xi8> to vector<1x512xi32>
    %c0_3 = arith.constant 0 : index
    %c0_4 = arith.constant 0 : index
    %3 = vector.load %arg3[%c0_3, %c0_4] : memref<1x512xi32, #tpu.memory_space<vmem>>, vector<1x512xi32>
    %c16777215_i32 = arith.constant 16777215 : i32
    %4 = vector.broadcast %c16777215_i32 : i32 to vector<1x512xi32>
    %5 = arith.andi %3, %4 : vector<1x512xi32>
    %c28_i32 = arith.constant 28 : i32
    %6 = vector.broadcast %c28_i32 : i32 to vector<1x512xi32>
    %7 = arith.muli %5, %6 : vector<1x512xi32>
    %c24_i32 = arith.constant 24 : i32
    %8 = vector.broadcast %c24_i32 : i32 to vector<1x512xi32>
    %9 = arith.shrui %7, %8 : vector<1x512xi32>
    %c4_i32 = arith.constant 4 : i32
    %10 = vector.broadcast %c4_i32 : i32 to vector<1x512xi32>
    %11 = arith.addi %10, %9 : vector<1x512xi32>
    %c1_i32 = arith.constant 1 : i32
    %12 = vector.broadcast %c1_i32 : i32 to vector<1x512xi32>
    %13 = arith.cmpi eq, %2, %12 : vector<1x512xi32>
    %c3_i32 = arith.constant 3 : i32
    %14 = vector.broadcast %c3_i32 : i32 to vector<1x512xi32>
    %15 = arith.select %13, %14, %0 : vector<1x512xi1>, vector<1x512xi32>
    %c2_i32 = arith.constant 2 : i32
    %16 = vector.broadcast %c2_i32 : i32 to vector<1x512xi32>
    %17 = arith.cmpi eq, %2, %16 : vector<1x512xi32>
    %18 = arith.select %17, %11, %15 : vector<1x512xi1>, vector<1x512xi32>
    %c0_5 = arith.constant 0 : index
    %c0_6 = arith.constant 0 : index
    %19 = vector.load %arg4[%c0_5, %c0_6] : memref<1x512xi32, #tpu.memory_space<vmem>>, vector<1x512xi32>
    tpu.vector_store %arg4[%c0_5, %c0_6], %18 {strides = array<i32>} : memref<1x512xi32, #tpu.memory_space<vmem>>, vector<1x512xi32>,
    return
  }
  func.func @transform_0(%arg0: i32) -> (i32, i32) {
    %c0_i32 = arith.constant 0 : i32
    %c0_i32_0 = arith.constant 0 : i32
    return %arg0, %c0_i32 : i32, i32
  }
  func.func @transform_1(%arg0: i32) -> (i32, i32) {
    %c0_i32 = arith.constant 0 : i32
    %c0_i32_0 = arith.constant 0 : i32
    return %arg0, %c0_i32 : i32, i32
  }
  func.func @transform_2(%arg0: i32) -> (i32, i32) {
    %c0_i32 = arith.constant 0 : i32
    %c0_i32_0 = arith.constant 0 : i32
    return %arg0, %c0_i32 : i32, i32
  }
  func.func @transform_3(%arg0: i32) -> (i32, i32) {
    %c0_i32 = arith.constant 0 : i32
    %c0_i32_0 = arith.constant 0 : i32
    return %arg0, %c0_i32 : i32, i32
  }
}

</mosaic_0001>

<bundles_post_ra>
// kernel: tpu_custom_call.1
= control target key start
LH: loop header
LB: loop body
LE: loop exit
PB: predicated region body
PF: predicated region fallthrough
CT: control target
= control target key end

     0   :  { %8 = vsyncpa [#allocation3], 0  ;;  %s200_s0 = inlined_call_operand.hbm [shape: s32[1,512], index: 0, kind: input, shape index: {}, may-alias: {0,3}]   ;;  %s201_s1 = inlined_call_operand.vmem [shape: s8[1,512], index: 1, kind: input, shape index: {}]   ;;  %s202_s2 = inlined_call_operand.vmem [shape: u32[1,512], index: 2, kind: input, shape index: {}]   ;;  %s203_s3 = inlined_call_operand.hbm [shape: s32[1,512], index: 3, kind: output, shape index: {}, may-alias: {0,3}]  }
   0x1   :  { %9 = vsyncpa [#allocation4], 0  ;;  %s163_s12 = smov [#allocation2]  }
   0x2   :  { %s16_s13 = sshll.u32 %s163_s12, 4  ;;  %s17_s13 = int_to_ptr.vmem [resolvable:$true] %s16_s13 }
   0x3   :  { %s127_s14 = scalar_lea.vmem %s17_s13, 64  ;;  %p132_p1 = scmp.lt.s32.totalorder %s17_s13, %s17_s13 }
   0x4   :  { %p128_p0 = scmp.ne.s32.totalorder %s17_s13, %s127_s14  ;;  %p133_p2 = scmp.lt.s32.totalorder %s127_s14, %s127_s14 }
   0x6   :  { %p134_p3 = por %p133_p2, %p132_p1 }
   0x8   :  { %p135_p4 = pnand %p134_p3, %p128_p0 }
   0xa   :  { %138 = shalt.err (!%p135_p4)
}
   0xb   :  { %19 = dma.hbm_to_vmem [thread:$0]  %s200_s0, 64, %s17_s13, [#allocation3]  }
   0xc   :  { %159 = dma.done.wait [#allocation3], 64  }
   0xd   :  { %160 = vsyncadd [#allocation3], 4294967232  ;;  %v41_v0 = vlaneseq  ;;  %v164_v1 = vmov 286326784   ;;  %v165_v3 = vmov 858989090   ;;  %s167_s0 = smov [#allocation5]  }
   0xe   :  { %v39_v2 = vunpack.c.l.s4 %v164_v1  ;;  %v46_v4 = vunpack.c.l.s4 %v165_v3  ;;  %v166_v8 = vmov 1966171168   ;;  %v28_v10 = vld [vmem:[%s201_s1] sm:$0xf]  ;;  %s105_s1 = sshll.u32 %s167_s0, 4  ;;  %s106_s1 = int_to_ptr.vmem [resolvable:$true] %s105_s1 }
   0xf   :  { %v42_v6 = vshrl.u32 %v41_v0, 7  ;;  %v73_v9 = vunpack.c.l.s4 %v166_v8  ;;  %v31_v11 = vld [vmem:[%s202_s2] sm:$0xf]  ;;  %v29_v15 = vunpack.c.0.s8 %v28_v10  ;;  %v30_v16 = vunpack.c.1.s8 %v28_v10  ;;  %s139_s2 = scalar_lea.vmem %s106_s1, 64  ;;  %p144_p6 = scmp.lt.s32.totalorder %s106_s1, %s106_s1 }
  0x10   :  { %v40_v5 = vunpack.c.0.s8 %v39_v2  ;;  %v47_v7 = vunpack.c.0.s8 %v46_v4  ;;  %v27_v14 = vld [vmem:[#allocation2] sm:$0xf]  ;;  %v32_v17 = vand.u32 16777215, %v31_v11  ;;  %vm96_vm4 = vcmp.lt.s32.totalorder %v41_v0, 512  ;;  %p140_p5 = scmp.ne.s32.totalorder %s106_s1, %s139_s2  ;;  %p145_p7 = scmp.lt.s32.totalorder %s139_s2, %s139_s2 }
  0x11   :  { %v74_v19 = vunpack.c.0.s8 %v73_v9  ;;  %vm36_vm0 = vcmp.eq.s32.totalorder %v29_v15, 1  ;;  %vm37_vm1 = vcmp.eq.s32.totalorder %v30_v16, 1  ;;  %vm54_vm2 = vcmp.eq.s32.totalorder %v29_v15, 2 }
  0x12   :  { %v43_v12 = vsub.s32 %v40_v5, %v42_v6  ;;  %v50_v13 = vsub.s32 %v47_v7, %v42_v6  ;;  %v33_v18 = vmul.u32 28, %v32_v17  ;;  %vm55_vm3 = vcmp.eq.s32.totalorder %v30_v16, 2  ;;  %p146_p8 = por %p145_p7, %p144_p6 }
  0x13   :  { %v77_v24 = vsub.s32 %v74_v19, %v42_v6 }
  0x14   :  { %v44_v20 = vrot.slane %v27_v14, %v43_v12  ;;  %v51_v21 = vrot.slane %v27_v14, %v50_v13  ;;  %v34_v22 = vshrl.u32 %v33_v18, 24  ;;  %p147_p9 = pnand %p146_p8, %p140_p5 }
  0x16   :  { %v35_v23 = vadd.s32 4, %v34_v22  ;;  %v52_v25 = vsel %vm36_vm0, 3, %v44_v20  ;;  %v53_v26 = vsel %vm37_vm1, 3, %v51_v21 }
  0x18   :  { %v62_v27 = vrot.slane %v35_v23, %v43_v12  ;;  %v69_v28 = vrot.slane %v35_v23, %v50_v13 }
  0x1a   :  { %v70_v29 = vsel %vm54_vm2, %v62_v27, %v52_v25  ;;  %v71_v30 = vsel %vm55_vm3, %v69_v28, %v53_v26 }
  0x1b   :  { %v78_v31 = vrot.slane %v70_v29, %v77_v24  ;;  %v85_v32 = vrot.slane %v71_v30, %v77_v24 }
  0x1d   :  { %v86_v33 = vcombine.low %v78_v31, %v85_v32 }
  0x1f   :  { %v93_v34 = vrot.slane %v86_v33, %v77_v24 }
  0x21   :  { %98 = vst.msk [vmem:[#allocation5] sm:$0xf] %vm96_vm4, %v93_v34 }
  0x22   :  { %150 = shalt.err (!%p147_p9)
}
  0x23   :  { %108 = dma.vmem_to_hbm [thread:$0]  %s106_s1, 64, %s203_s3, [#allocation4]  }
  0x24   :  { %161 = dma.done.wait [#allocation4], 64  }
  0x25   :  { %162 = vsyncadd [#allocation4], 4294967232 }
  0x26   :  { %112 = vsyncpa [#allocation3], 1 }
  0x27   :  { %113 = vsyncpa [#allocation4], 1 }

</bundles_post_ra>
